<compile_context>
chip_gen: v7x
topology: tpu7x:2x2x1
jax: 0.10.0
libtpu: 0.0.40
codegen_flags: <defaults>
</compile_context>

<pallas_src>
import jax
import jax.numpy as jnp
from jax.experimental import pallas as pl
from jax.experimental.pallas import tpu as pltpu

NUM_CLASSES = 8
FOCAL_ALPHA = 0.25
FOCAL_GAMMA = 2.0   # gamma == 2.0 -> pt**gamma computed as pt*pt inside the kernel
W_CLS = 2.0
W_BBOX = 5.0
W_GIOU = 2.0
EPS = 1e-6
_LANES = 128
_TDAT_ROWS = 16     # 4 tgt xyxy + 4 tgt xyxy norm + 4 inv imgsz + mask + area + 2 pad


def _criterion_kernel(logits_ref, tgt_ref, pboxes_ref, tdat_ref, out_ref):
    # logits_ref: (1, Sc, 128)  lane-dense flattened [B*N*C] logits of head h
    # tgt_ref:    (Sc, 128)     precomputed one-hot targets (background -> 0), shared
    # pboxes_ref: (1, 4, Lb)    pred boxes xyxy abs, component-major, per head
    # tdat_ref:   (16, Lb)      packed head-invariant per-proposal data, shared:
    #                             rows 0-3  : target xyxy abs
    #                             rows 4-7  : target xyxy normalized
    #                             rows 8-11 : 1 / (w, h, w, h)    (padding == 1.0)
    #                             row  12   : match mask (1.0 where matched)
    #                             row  13   : target box area (abs)
    # out_ref:    (1, 3, 128)   rows = [loss_cls, loss_bbox, loss_giou] (lane-splat)
    logits = logits_ref[0]            # (Sc, 128)
    tgt = tgt_ref[...]                # (Sc, 128)
    tdat = tdat_ref[...]              # (16, Lb)

    tb = tdat[0:4, :]                 # target xyxy abs
    tn = tdat[4:8, :]                 # target xyxy normalized
    inv_sz = tdat[8:12, :]            # reciprocal image size
    mask = tdat[12:13, :]             # (1, Lb)
    area_g = tdat[13:14, :]           # (1, Lb)

    n_inst = jnp.maximum(jnp.sum(mask, keepdims=True), 1.0)   # (1, 1)
    inv_n = 1.0 / n_inst

    # ---- sigmoid focal loss (alpha=0.25, gamma=2) --------------------------
    # One exp(-|x|) feeds both the sigmoid and the BCE log term.
    e = jnp.exp(-jnp.abs(logits))
    inv1pe = 1.0 / (1.0 + e)                                  # exact (keeps tol)
    p = jnp.where(logits >= 0.0, inv1pe, 1.0 - inv1pe)        # == sigmoid(logits)
    pt = (1.0 - p) * tgt + p * (1.0 - tgt)
    alpha_t = 0.75 - 0.5 * tgt        # == 0.25*t + 0.75*(1-t) for t in {0,1}
    bce = jnp.maximum(logits, 0.0) - logits * tgt + jnp.log(1.0 + e)
    loss_cls = W_CLS * jnp.sum(bce * alpha_t * (pt * pt), keepdims=True) * inv_n

    # ---- L1 on normalized boxes (target xyxy precomputed in the wrapper) ----
    pb = pboxes_ref[0]                # (4, Lb) pred xyxy abs
    pn = pb * inv_sz                  # pred boxes normalized (mul, not div)
    loss_bbox = W_BBOX * jnp.sum(jnp.abs(pn - tn) * mask, keepdims=True) * inv_n

    # ---- GIoU on absolute boxes ---------------------------------------------
    p_lo, p_hi = pb[0:2, :], pb[2:4, :]
    g_lo, g_hi = tb[0:2, :], tb[2:4, :]
    wh_p = p_hi - p_lo
    area_p = wh_p[0:1, :] * wh_p[1:2, :]
    iwh = jnp.maximum(jnp.minimum(p_hi, g_hi) - jnp.maximum(p_lo, g_lo), 0.0)
    inter = iwh[0:1, :] * iwh[1:2, :]
    union = jnp.maximum(area_p + area_g - inter, EPS)
    ewh = jnp.maximum(p_hi, g_hi) - jnp.minimum(p_lo, g_lo)
    enclose = jnp.maximum(ewh[0:1, :] * ewh[1:2, :], EPS)
    giou = inter / union - (enclose - union) / enclose
    loss_giou = W_GIOU * jnp.sum((1.0 - giou) * mask, keepdims=True) * inv_n

    out_ref[0] = jnp.concatenate(
        [jnp.broadcast_to(loss_cls, (1, _LANES)),
         jnp.broadcast_to(loss_bbox, (1, _LANES)),
         jnp.broadcast_to(loss_giou, (1, _LANES))], axis=0)


def _round_up(x, m):
    return (x + m - 1) // m * m


@jax.jit
def diffusiondet_losses_fused(logits_heads, boxes_heads, target_classes,
                              match_mask, target_boxes_xyxy,
                              target_boxes_norm_cxcywh, image_size):
    """All heads (main + aux) in one Pallas call.

    logits_heads: [NH, B, N, C]; boxes_heads: [NH, B, N, 4] (xyxy abs)
    target_classes: [B, N] int32 (== C for background); match_mask: [B, N]
    target_boxes_xyxy / target_boxes_norm_cxcywh: [B, N, 4]
    image_size: [B, 4] (w, h, w, h)
    Returns (loss_cls, loss_bbox, loss_giou), each of shape [NH].
    """
    NH, B, N, C = logits_heads.shape
    BN = B * N
    Lc = _round_up(BN * C, _LANES)
    Sc = Lc // _LANES
    Lb = _round_up(BN, _LANES)

    # ---- lane-dense classification tensors ---------------------------------
    PAD_LOGIT = -100.0   # sigmoid(-100) == 0 in f32 -> zero focal/BCE padding term
    lg = logits_heads.reshape(NH, BN * C).astype(jnp.float32)
    lg = jnp.pad(lg, ((0, 0), (0, Lc - BN * C)), constant_values=PAD_LOGIT)
    lg = lg.reshape(NH, Sc, _LANES)

    onehot = jax.nn.one_hot(target_classes.reshape(BN), C + 1,
                            dtype=jnp.float32)[:, :C]          # background -> zeros
    onehot = jnp.pad(onehot.reshape(BN * C), (0, Lc - BN * C)).reshape(Sc, _LANES)

    # ---- component-major, lane-dense box tensors ----------------------------
    def cm(x, pad_value=0.0):                                   # [B, N, 4] -> [4, Lb]
        t = x.reshape(BN, 4).astype(jnp.float32).T
        return jnp.pad(t, ((0, 0), (0, Lb - BN)), constant_values=pad_value)

    pboxes = jnp.pad(
        jnp.transpose(boxes_heads.reshape(NH, BN, 4).astype(jnp.float32),
                      (0, 2, 1)),
        ((0, 0), (0, 0), (0, Lb - BN)))                         # [NH, 4, Lb]

    # head-invariant per-proposal data, hoisted out of the kernel & packed
    tboxes = cm(target_boxes_xyxy)                              # target xyxy abs
    cx, cy, w, h = (target_boxes_norm_cxcywh[..., i] for i in range(4))
    tnorm_xyxy = jnp.stack([cx - w / 2, cy - h / 2, cx + w / 2, cy + h / 2],
                           axis=-1)                             # cxcywh -> xyxy once
    tnx = cm(tnorm_xyxy)
    inv_sz = cm(jnp.broadcast_to((1.0 / image_size)[:, None, :], (B, N, 4)),
                pad_value=1.0)                                  # reciprocal; pad 1.0
    maskr = jnp.pad(match_mask.reshape(1, BN).astype(jnp.float32),
                    ((0, 0), (0, Lb - BN)))
    area_g = ((target_boxes_xyxy[..., 2] - target_boxes_xyxy[..., 0]) *
              (target_boxes_xyxy[..., 3] - target_boxes_xyxy[..., 1]))
    area_g = jnp.pad(area_g.reshape(1, BN).astype(jnp.float32),
                     ((0, 0), (0, Lb - BN)))
    tdat = jnp.concatenate(
        [tboxes, tnx, inv_sz, maskr, area_g, jnp.zeros((2, Lb), jnp.float32)],
        axis=0)                                                 # (16, Lb)

    cost = pl.CostEstimate(
        flops=int(NH * (20 * Lc + 120 * Lb)),
        transcendentals=int(3 * NH * Lc),
        bytes_accessed=int(4 * (lg.size + onehot.size + pboxes.size +
                                tdat.size + 3 * NH * _LANES)))

    grid_spec = pltpu.PrefetchScalarGridSpec(
        num_scalar_prefetch=0,
        grid=(NH,),
        in_specs=[
            pl.BlockSpec((1, Sc, _LANES), lambda h: (h, 0, 0)),   # logits (per head)
            pl.BlockSpec((Sc, _LANES), lambda h: (0, 0)),         # one-hot (shared)
            pl.BlockSpec((1, 4, Lb), lambda h: (h, 0, 0)),        # pred boxes
            pl.BlockSpec((_TDAT_ROWS, Lb), lambda h: (0, 0)),     # packed targets
        ],
        out_specs=pl.BlockSpec((1, 3, _LANES), lambda h: (h, 0, 0)),
    )

    out = pl.pallas_call(
        _criterion_kernel,
        out_shape=jax.ShapeDtypeStruct((NH, 3, _LANES), jnp.float32),
        grid_spec=grid_spec,
        compiler_params=pltpu.CompilerParams(
            dimension_semantics=("parallel",)),   # v7x: shard heads over 2 TCs
        cost_estimate=cost,
    )(lg, onehot, pboxes, tdat)

    return out[:, 0, 0], out[:, 1, 0], out[:, 2, 0]


# ------------------------- host-side glue (plain JAX) ----------------------------
def xyxy_to_cxcywh(b):
    x1, y1, x2, y2 = b[..., 0], b[..., 1], b[..., 2], b[..., 3]
    return jnp.stack([(x1 + x2) / 2, (y1 + y2) / 2, x2 - x1, y2 - y1], axis=-1)


def build_dense_targets(B, N, C, gt_boxes, gt_labels, indices, imgsize):
    target_classes = jnp.full((B, N), C, jnp.int32)
    mask = jnp.zeros((B, N), jnp.float32)
    tboxes = jnp.zeros((B, N, 4), jnp.float32)
    tnorm = jnp.zeros((B, N, 4), jnp.float32)
    for b, (src, tgt) in enumerate(indices):
        target_classes = target_classes.at[b, src].set(
            gt_labels[b][tgt].astype(jnp.int32))
        mask = mask.at[b, src].set(1.0)
        tboxes = tboxes.at[b, src].set(gt_boxes[b][tgt])
        norm_cxcywh = xyxy_to_cxcywh(gt_boxes[b] / imgsize[b])
        tnorm = tnorm.at[b, src].set(norm_cxcywh[tgt])
    return target_classes, mask, tboxes, tnorm


def ref_losses(logits, tclass, pboxes, tboxes, tnorm, imgsize, mask):
    """Pure-JAX reference of the same math (for a correctness check)."""
    B, N, C = logits.shape
    n_inst = jnp.maximum(jnp.sum(mask), 1.0)
    tgt = jax.nn.one_hot(tclass, C + 1, dtype=jnp.float32)[..., :C]
    p = jax.nn.sigmoid(logits)
    pt = (1 - p) * tgt + p * (1 - tgt)
    fw = (FOCAL_ALPHA * tgt + (1 - FOCAL_ALPHA) * (1 - tgt)) * pt ** 2
    bce = jnp.maximum(logits, 0) - logits * tgt + jnp.log1p(jnp.exp(-jnp.abs(logits)))
    loss_cls = W_CLS * jnp.sum(bce * fw) / n_inst
    pnorm = pboxes / imgsize[:, None, :]
    cx, cy, w, h = tnorm[..., 0], tnorm[..., 1], tnorm[..., 2], tnorm[..., 3]
    txyxy = jnp.stack([cx - w / 2, cy - h / 2, cx + w / 2, cy + h / 2], -1)
    loss_bbox = W_BBOX * jnp.sum(jnp.abs(pnorm - txyxy) * mask[..., None]) / n_inst
    ap = (pboxes[..., 2] - pboxes[..., 0]) * (pboxes[..., 3] - pboxes[..., 1])
    ag = (tboxes[..., 2] - tboxes[..., 0]) * (tboxes[..., 3] - tboxes[..., 1])
    iw = jnp.maximum(jnp.minimum(pboxes[..., 2], tboxes[..., 2]) -
                     jnp.maximum(pboxes[..., 0], tboxes[..., 0]), 0)
    ih = jnp.maximum(jnp.minimum(pboxes[..., 3], tboxes[..., 3]) -
                     jnp.maximum(pboxes[..., 1], tboxes[..., 1]), 0)
    inter = iw * ih
    union = jnp.maximum(ap + ag - inter, EPS)
    iou = inter / union
    ew = jnp.maximum(pboxes[..., 2], tboxes[..., 2]) - jnp.minimum(pboxes[..., 0], tboxes[..., 0])
    eh = jnp.maximum(pboxes[..., 3], tboxes[..., 3]) - jnp.minimum(pboxes[..., 1], tboxes[..., 1])
    enc = jnp.maximum(ew * eh, EPS)
    giou = iou - (enc - union) / enc
    loss_giou = W_GIOU * jnp.sum((1 - giou) * mask) / n_inst
    return loss_cls, loss_bbox, loss_giou


if __name__ == "__main__":
    key = jax.random.PRNGKey(0)
    B, N, C = 2, 8, NUM_CLASSES
    NUM_AUX = 2          # deep_supervision=True -> aux heads
    W, H = 64.0, 48.0
    imgsize = jnp.array([[W, H, W, H], [W, H, W, H]], jnp.float32)

    # ground truth (deterministic)
    gt_boxes = [
        jnp.array([[5., 6., 30., 28.],
                   [20., 4., 55., 40.],
                   [10., 10., 25., 45.]], jnp.float32),
        jnp.array([[2., 3., 40., 20.],
                   [30., 10., 60., 44.]], jnp.float32),
    ]
    gt_labels = [jnp.array([2, 5, 0], jnp.int32), jnp.array([3, 7], jnp.int32)]
    # matching indices (stand-in for the assigner output): (pred_idx, gt_idx) per image
    indices = [(jnp.array([1, 4, 6]), jnp.array([0, 1, 2])),
               (jnp.array([0, 5]), jnp.array([0, 1]))]

    tclass, mask, tboxes, tnorm = build_dense_targets(
        B, N, C, gt_boxes, gt_labels, indices, imgsize)

    def make_head(k):
        k1, k2, k3 = jax.random.split(k, 3)
        logits = jax.random.normal(k1, (B, N, C), jnp.float32)
        xy1 = jax.random.uniform(k2, (B, N, 2), jnp.float32) * jnp.array([W * 0.5, H * 0.5])
        wh = jax.random.uniform(k3, (B, N, 2), jnp.float32,
                                minval=0.1, maxval=0.45) * jnp.array([W, H])
        boxes = jnp.concatenate([xy1, xy1 + wh], axis=-1)
        return logits, boxes

    keys = jax.random.split(key, 1 + NUM_AUX)
    heads = [make_head(k) for k in keys]            # head 0 = main, rest = aux
    logits_heads = jnp.stack([h[0] for h in heads], axis=0)   # [NH, B, N, C]
    boxes_heads = jnp.stack([h[1] for h in heads], axis=0)    # [NH, B, N, 4]

    # one fused kernel call for main + all aux heads
    lc_all, lb_all, lg_all = diffusiondet_losses_fused(
        logits_heads, boxes_heads, tclass, mask, tboxes, tnorm, imgsize)
    jax.block_until_ready((lc_all, lb_all, lg_all))

    losses = {"loss_cls": lc_all[0], "loss_bbox": lb_all[0], "loss_giou": lg_all[0]}
    for i in range(NUM_AUX):
        losses[f"s.{i}.loss_cls"] = lc_all[i + 1]
        losses[f"s.{i}.loss_bbox"] = lb_all[i + 1]
        losses[f"s.{i}.loss_giou"] = lg_all[i + 1]

    # correctness check against a pure-JAX reference of the same math, per head
    for h in range(1 + NUM_AUX):
        rc, rb, rg = ref_losses(logits_heads[h], tclass, boxes_heads[h],
                                tboxes, tnorm, imgsize, mask)
        assert jnp.allclose(lc_all[h], rc, rtol=1e-4, atol=1e-4), (h, lc_all[h], rc)
        assert jnp.allclose(lb_all[h], rb, rtol=1e-4, atol=1e-4), (h, lb_all[h], rb)
        assert jnp.allclose(lg_all[h], rg, rtol=1e-4, atol=1e-4), (h, lg_all[h], rg)

    print("KERNEL_OK")
</pallas_src>

<mosaic_0001>
module attributes {stable_mosaic.version = 11 : i64} {
  func.func @_criterion_kernel(%arg0: i32, %arg1: memref<1x1x128xf32, #tpu.memory_space<vmem>>, %arg2: memref<1x128xf32, #tpu.memory_space<vmem>>, %arg3: memref<1x4x128xf32, #tpu.memory_space<vmem>>, %arg4: memref<16x128xf32, #tpu.memory_space<vmem>>, %arg5: memref<1x3x128xf32, #tpu.memory_space<vmem>>) attributes {dimension_semantics = [#tpu.dimension_semantics<parallel>], iteration_bounds = array<i64: 3>, scalar_prefetch = 0 : i64, scratch_operands = 0 : i64, tpu.core_type = #tpu.core_type<tc>, window_params = [{transform_indices = @transform_0, window_bounds = array<i64: 1, 1, 128>}, {pipeline_mode = #tpu.pipeline_mode<synchronous>, transform_indices = @transform_1, window_bounds = array<i64: 1, 128>}, {transform_indices = @transform_2, window_bounds = array<i64: 1, 4, 128>}, {pipeline_mode = #tpu.pipeline_mode<synchronous>, transform_indices = @transform_3, window_bounds = array<i64: 16, 128>}, {transform_indices = @transform_4, window_bounds = array<i64: 1, 3, 128>}]} {
    %c0 = arith.constant 0 : index
    %c0_0 = arith.constant 0 : index
    %c0_1 = arith.constant 0 : index
    %0 = vector.load %arg1[%c0, %c0_0, %c0_1] : memref<1x1x128xf32, #tpu.memory_space<vmem>>, vector<1x1x128xf32>
    %1 = vector.shape_cast %0 : vector<1x1x128xf32> to vector<1x128xf32>
    %c0_2 = arith.constant 0 : index
    %c0_3 = arith.constant 0 : index
    %2 = vector.load %arg2[%c0_2, %c0_3] : memref<1x128xf32, #tpu.memory_space<vmem>>, vector<1x128xf32>
    %c0_4 = arith.constant 0 : index
    %c0_5 = arith.constant 0 : index
    %3 = vector.load %arg4[%c0_4, %c0_5] : memref<16x128xf32, #tpu.memory_space<vmem>>, vector<16x128xf32>
    %4 = vector.extract_strided_slice %3 {offsets = [0, 0], sizes = [4, 128], strides = [1, 1]} : vector<16x128xf32> to vector<4x128xf32>
    %5 = vector.extract_strided_slice %3 {offsets = [4, 0], sizes = [4, 128], strides = [1, 1]} : vector<16x128xf32> to vector<4x128xf32>
    %6 = vector.extract_strided_slice %3 {offsets = [8, 0], sizes = [4, 128], strides = [1, 1]} : vector<16x128xf32> to vector<4x128xf32>
    %7 = vector.extract_strided_slice %3 {offsets = [12, 0], sizes = [1, 128], strides = [1, 1]} : vector<16x128xf32> to vector<1x128xf32>
    %8 = vector.extract_strided_slice %3 {offsets = [13, 0], sizes = [1, 128], strides = [1, 1]} : vector<16x128xf32> to vector<1x128xf32>
    %9 = vector.shape_cast %7 : vector<1x128xf32> to vector<1x1x128xf32>
    %cst = arith.constant dense<0.000000e+00> : vector<1xf32>
    %10 = vector.multi_reduction <add>, %9, %cst [1, 2] : vector<1x1x128xf32> to vector<1xf32>
    %11 = vector.shape_cast %10 : vector<1xf32> to vector<1x1x1xf32>
    %12 = vector.extract %11[0, 0, 0] : f32 from vector<1x1x1xf32>
    %13 = vector.broadcast %12 : f32 to vector<1x1xf32>
    %cst_6 = arith.constant 1.000000e+00 : f32
    %14 = vector.broadcast %cst_6 : f32 to vector<1x1xf32>
    %15 = arith.maximumf %13, %14 : vector<1x1xf32>
    %cst_7 = arith.constant 1.000000e+00 : f32
    %16 = vector.broadcast %cst_7 : f32 to vector<1x1xf32>
    %17 = arith.divf %16, %15 : vector<1x1xf32>
    %18 = math.absf %1 : vector<1x128xf32>
    %cst_8 = arith.constant 0.000000e+00 : f32
    %19 = vector.broadcast %cst_8 : f32 to vector<1x128xf32>
    %20 = arith.subf %19, %18 : vector<1x128xf32>
    %21 = math.exp %20 : vector<1x128xf32>
    %cst_9 = arith.constant 1.000000e+00 : f32
    %22 = vector.broadcast %cst_9 : f32 to vector<1x128xf32>
    %23 = arith.addf %22, %21 : vector<1x128xf32>
    %cst_10 = arith.constant 1.000000e+00 : f32
    %24 = vector.broadcast %cst_10 : f32 to vector<1x128xf32>
    %25 = arith.divf %24, %23 : vector<1x128xf32>
    %cst_11 = arith.constant 0.000000e+00 : f32
    %26 = vector.broadcast %cst_11 : f32 to vector<1x128xf32>
    %27 = arith.cmpf oge, %1, %26 : vector<1x128xf32>
    %cst_12 = arith.constant 1.000000e+00 : f32
    %28 = vector.broadcast %cst_12 : f32 to vector<1x128xf32>
    %29 = arith.subf %28, %25 : vector<1x128xf32>
    %30 = arith.select %27, %25, %29 : vector<1x128xi1>, vector<1x128xf32>
    %cst_13 = arith.constant 1.000000e+00 : f32
    %31 = vector.broadcast %cst_13 : f32 to vector<1x128xf32>
    %32 = arith.subf %31, %30 : vector<1x128xf32>
    %33 = arith.mulf %32, %2 : vector<1x128xf32>
    %cst_14 = arith.constant 1.000000e+00 : f32
    %34 = vector.broadcast %cst_14 : f32 to vector<1x128xf32>
    %35 = arith.subf %34, %2 : vector<1x128xf32>
    %36 = arith.mulf %30, %35 : vector<1x128xf32>
    %37 = arith.addf %33, %36 : vector<1x128xf32>
    %cst_15 = arith.constant 5.000000e-01 : f32
    %38 = vector.broadcast %cst_15 : f32 to vector<1x128xf32>
    %39 = arith.mulf %38, %2 : vector<1x128xf32>
    %cst_16 = arith.constant 7.500000e-01 : f32
    %40 = vector.broadcast %cst_16 : f32 to vector<1x128xf32>
    %41 = arith.subf %40, %39 : vector<1x128xf32>
    %cst_17 = arith.constant 0.000000e+00 : f32
    %42 = vector.broadcast %cst_17 : f32 to vector<1x128xf32>
    %43 = arith.maximumf %1, %42 : vector<1x128xf32>
    %44 = arith.mulf %1, %2 : vector<1x128xf32>
    %45 = arith.subf %43, %44 : vector<1x128xf32>
    %cst_18 = arith.constant 1.000000e+00 : f32
    %46 = vector.broadcast %cst_18 : f32 to vector<1x128xf32>
    %47 = arith.addf %46, %21 : vector<1x128xf32>
    %48 = math.log %47 : vector<1x128xf32>
    %49 = arith.addf %45, %48 : vector<1x128xf32>
    %50 = arith.mulf %49, %41 : vector<1x128xf32>
    %51 = arith.mulf %37, %37 : vector<1x128xf32>
    %52 = arith.mulf %50, %51 : vector<1x128xf32>
    %53 = vector.shape_cast %52 : vector<1x128xf32> to vector<1x1x128xf32>
    %cst_19 = arith.constant dense<0.000000e+00> : vector<1xf32>
    %54 = vector.multi_reduction <add>, %53, %cst_19 [1, 2] : vector<1x1x128xf32> to vector<1xf32>
    %55 = vector.shape_cast %54 : vector<1xf32> to vector<1x1x1xf32>
    %56 = vector.extract %55[0, 0, 0] : f32 from vector<1x1x1xf32>
    %57 = vector.broadcast %56 : f32 to vector<1x1xf32>
    %cst_20 = arith.constant 2.000000e+00 : f32
    %58 = vector.broadcast %cst_20 : f32 to vector<1x1xf32>
    %59 = arith.mulf %58, %57 : vector<1x1xf32>
    %60 = arith.mulf %59, %17 : vector<1x1xf32>
    %c0_21 = arith.constant 0 : index
    %c0_22 = arith.constant 0 : index
    %c0_23 = arith.constant 0 : index
    %61 = vector.load %arg3[%c0_21, %c0_22, %c0_23] : memref<1x4x128xf32, #tpu.memory_space<vmem>>, vector<1x4x128xf32>
    %62 = vector.shape_cast %61 : vector<1x4x128xf32> to vector<4x128xf32>
    %63 = arith.mulf %62, %6 : vector<4x128xf32>
    %64 = arith.subf %63, %5 : vector<4x128xf32>
    %65 = math.absf %64 : vector<4x128xf32>
    %66 = vector.broadcast %7 : vector<1x128xf32> to vector<4x128xf32>
    %67 = arith.mulf %65, %66 : vector<4x128xf32>
    %68 = vector.shape_cast %67 : vector<4x128xf32> to vector<1x4x128xf32>
    %cst_24 = arith.constant dense<0.000000e+00> : vector<1xf32>
    %69 = vector.multi_reduction <add>, %68, %cst_24 [1, 2] : vector<1x4x128xf32> to vector<1xf32>
    %70 = vector.shape_cast %69 : vector<1xf32> to vector<1x1x1xf32>
    %71 = vector.extract %70[0, 0, 0] : f32 from vector<1x1x1xf32>
    %72 = vector.broadcast %71 : f32 to vector<1x1xf32>
    %cst_25 = arith.constant 5.000000e+00 : f32
    %73 = vector.broadcast %cst_25 : f32 to vector<1x1xf32>
    %74 = arith.mulf %73, %72 : vector<1x1xf32>
    %75 = arith.mulf %74, %17 : vector<1x1xf32>
    %76 = vector.extract_strided_slice %62 {offsets = [0, 0], sizes = [2, 128], strides = [1, 1]} : vector<4x128xf32> to vector<2x128xf32>
    %77 = vector.extract_strided_slice %62 {offsets = [2, 0], sizes = [2, 128], strides = [1, 1]} : vector<4x128xf32> to vector<2x128xf32>
    %78 = vector.extract_strided_slice %4 {offsets = [0, 0], sizes = [2, 128], strides = [1, 1]} : vector<4x128xf32> to vector<2x128xf32>
    %79 = vector.extract_strided_slice %4 {offsets = [2, 0], sizes = [2, 128], strides = [1, 1]} : vector<4x128xf32> to vector<2x128xf32>
    %80 = arith.subf %77, %76 : vector<2x128xf32>
    %81 = vector.extract_strided_slice %80 {offsets = [0, 0], sizes = [1, 128], strides = [1, 1]} : vector<2x128xf32> to vector<1x128xf32>
    %82 = vector.extract_strided_slice %80 {offsets = [1, 0], sizes = [1, 128], strides = [1, 1]} : vector<2x128xf32> to vector<1x128xf32>
    %83 = arith.mulf %81, %82 : vector<1x128xf32>
    %84 = arith.minimumf %77, %79 : vector<2x128xf32>
    %85 = arith.maximumf %76, %78 : vector<2x128xf32>
    %86 = arith.subf %84, %85 : vector<2x128xf32>
    %cst_26 = arith.constant 0.000000e+00 : f32
    %87 = vector.broadcast %cst_26 : f32 to vector<2x128xf32>
    %88 = arith.maximumf %86, %87 : vector<2x128xf32>
    %89 = vector.extract_strided_slice %88 {offsets = [0, 0], sizes = [1, 128], strides = [1, 1]} : vector<2x128xf32> to vector<1x128xf32>
    %90 = vector.extract_strided_slice %88 {offsets = [1, 0], sizes = [1, 128], strides = [1, 1]} : vector<2x128xf32> to vector<1x128xf32>
    %91 = arith.mulf %89, %90 : vector<1x128xf32>
    %92 = arith.addf %83, %8 : vector<1x128xf32>
    %93 = arith.subf %92, %91 : vector<1x128xf32>
    %cst_27 = arith.constant 9.99999997E-7 : f32
    %94 = vector.broadcast %cst_27 : f32 to vector<1x128xf32>
    %95 = arith.maximumf %93, %94 : vector<1x128xf32>
    %96 = arith.maximumf %77, %79 : vector<2x128xf32>
    %97 = arith.minimumf %76, %78 : vector<2x128xf32>
    %98 = arith.subf %96, %97 : vector<2x128xf32>
    %99 = vector.extract_strided_slice %98 {offsets = [0, 0], sizes = [1, 128], strides = [1, 1]} : vector<2x128xf32> to vector<1x128xf32>
    %100 = vector.extract_strided_slice %98 {offsets = [1, 0], sizes = [1, 128], strides = [1, 1]} : vector<2x128xf32> to vector<1x128xf32>
    %101 = arith.mulf %99, %100 : vector<1x128xf32>
    %cst_28 = arith.constant 9.99999997E-7 : f32
    %102 = vector.broadcast %cst_28 : f32 to vector<1x128xf32>
    %103 = arith.maximumf %101, %102 : vector<1x128xf32>
    %104 = arith.divf %91, %95 : vector<1x128xf32>
    %105 = arith.subf %103, %95 : vector<1x128xf32>
    %106 = arith.divf %105, %103 : vector<1x128xf32>
    %107 = arith.subf %104, %106 : vector<1x128xf32>
    %cst_29 = arith.constant 1.000000e+00 : f32
    %108 = vector.broadcast %cst_29 : f32 to vector<1x128xf32>
    %109 = arith.subf %108, %107 : vector<1x128xf32>
    %110 = arith.mulf %109, %7 : vector<1x128xf32>
    %111 = vector.shape_cast %110 : vector<1x128xf32> to vector<1x1x128xf32>
    %cst_30 = arith.constant dense<0.000000e+00> : vector<1xf32>
    %112 = vector.multi_reduction <add>, %111, %cst_30 [1, 2] : vector<1x1x128xf32> to vector<1xf32>
    %113 = vector.shape_cast %112 : vector<1xf32> to vector<1x1x1xf32>
    %114 = vector.extract %113[0, 0, 0] : f32 from vector<1x1x1xf32>
    %115 = vector.broadcast %114 : f32 to vector<1x1xf32>
    %cst_31 = arith.constant 2.000000e+00 : f32
    %116 = vector.broadcast %cst_31 : f32 to vector<1x1xf32>
    %117 = arith.mulf %116, %115 : vector<1x1xf32>
    %118 = arith.mulf %117, %17 : vector<1x1xf32>
    %119 = vector.shape_cast %60 : vector<1x1xf32> to vector<1x1xf32>
    %120 = vector.broadcast %119 : vector<1x1xf32> to vector<1x128xf32>
    %121 = vector.shape_cast %75 : vector<1x1xf32> to vector<1x1xf32>
    %122 = vector.broadcast %121 : vector<1x1xf32> to vector<1x128xf32>
    %123 = vector.shape_cast %118 : vector<1x1xf32> to vector<1x1xf32>
    %124 = vector.broadcast %123 : vector<1x1xf32> to vector<1x128xf32>
    %125 = tpu.concatenate %120, %122, %124 in 0 : vector<1x128xf32>, vector<1x128xf32>, vector<1x128xf32> -> vector<3x128xf32>
    %c0_32 = arith.constant 0 : index
    %c0_33 = arith.constant 0 : index
    %c0_34 = arith.constant 0 : index
    %126 = vector.load %arg5[%c0_32, %c0_33, %c0_34] : memref<1x3x128xf32, #tpu.memory_space<vmem>>, vector<1x3x128xf32>
    %127 = vector.shape_cast %126 : vector<1x3x128xf32> to vector<3x128xf32>
    %128 = vector.shape_cast %125 : vector<3x128xf32> to vector<1x3x128xf32>
    tpu.vector_store %arg5[%c0_32, %c0_33, %c0_34], %128 {strides = array<i32>} : memref<1x3x128xf32, #tpu.memory_space<vmem>>, vector<1x3x128xf32>,
    return
  }
  func.func @transform_0(%arg0: i32) -> (i32, i32, i32) {
    %c0_i32 = arith.constant 0 : i32
    %c0_i32_0 = arith.constant 0 : i32
    %c0_i32_1 = arith.constant 0 : i32
    return %arg0, %c0_i32, %c0_i32_0 : i32, i32, i32
  }
  func.func @transform_1(%arg0: i32) -> (i32, i32) {
    %c0_i32 = arith.constant 0 : i32
    %c0_i32_0 = arith.constant 0 : i32
    %c0_i32_1 = arith.constant 0 : i32
    return %c0_i32, %c0_i32_0 : i32, i32
  }
  func.func @transform_2(%arg0: i32) -> (i32, i32, i32) {
    %c0_i32 = arith.constant 0 : i32
    %c0_i32_0 = arith.constant 0 : i32
    %c0_i32_1 = arith.constant 0 : i32
    return %arg0, %c0_i32, %c0_i32_0 : i32, i32, i32
  }
  func.func @transform_3(%arg0: i32) -> (i32, i32) {
    %c0_i32 = arith.constant 0 : i32
    %c0_i32_0 = arith.constant 0 : i32
    %c0_i32_1 = arith.constant 0 : i32
    return %c0_i32, %c0_i32_0 : i32, i32
  }
  func.func @transform_4(%arg0: i32) -> (i32, i32, i32) {
    %c0_i32 = arith.constant 0 : i32
    %c0_i32_0 = arith.constant 0 : i32
    %c0_i32_1 = arith.constant 0 : i32
    return %arg0, %c0_i32, %c0_i32_0 : i32, i32, i32
  }
}

</mosaic_0001>

<bundles_post_ra>
// kernel: eq.1
= control target key start
LH: loop header
LB: loop body
LE: loop exit
PB: predicated region body
PF: predicated region fallthrough
CT: control target
= control target key end

     0   :  { %vm7_vm0 = vcmask 64512   ;;  %vm13_vm1 = vcmask 130112   ;;  %s39_s0 = inlined_call_operand.vmem [shape: s32[2,8], index: 0, kind: input, shape index: {}]   ;;  %s40_s1 = inlined_call_operand.vmem [shape: s32[16], index: 1, kind: output, shape index: {}]  }
   0x1   :  { %v4_v0 = vld [vmem:[%s39_s0] sm:$0x3]  ;;  %s22_s0 = smov 8  }
   0x2   :  { %5 = vst [vmem:[#allocation1] sm:$0x3] %v4_v0 }
   0x9   :  { %v10_v1 = vld [vmem:[#allocation1 + $0x1] sm:$0x1]   ;;  %v6_v2 = vld [vmem:[#allocation1] sm:$0x1]  }
   0xa   :  { %11 = vrot.lane.b32.xlu0 %v10_v1, %s22_s0  ;;  %8 = vst.msk [vmem:[#allocation0] sm:$0x1] %vm7_vm0, %v6_v2  }
  0x7c   :  { %v12_v3 = vpop.permute.xlu0 %11  }
  0x7d   :  { %14 = vst.msk [vmem:[#allocation0] sm:$0x1] %vm13_vm1, %v12_v3  }
  0x84   :  { %v18_v4 = vld [vmem:[#allocation0] sm:$0x1] }
  0x85   :  { %20 = vst [vmem:[%s40_s1] sm:$0x1] %v18_v4 }

// kernel: diffusiondet_losses_fused.1
= control target key start
LH: loop header
LB: loop body
LE: loop exit
PB: predicated region body
PF: predicated region fallthrough
CT: control target
= control target key end

     0   :  { %s489_s15 = smov 0   ;;  %s537_s0 = inlined_call_operand.vmem [shape: f32[3,1,128], index: 0, kind: input, shape index: {}]   ;;  %s538_s1 = inlined_call_operand.vmem [shape: f32[1,128], index: 1, kind: input, shape index: {}]   ;;  %s539_s2 = inlined_call_operand.vmem [shape: f32[3,4,128], index: 2, kind: input, shape index: {}]   ;;  %s540_s3 = inlined_call_operand.vmem [shape: f32[16,128], index: 3, kind: input, shape index: {}]   ;;  %s541_s4 = inlined_call_operand.vmem [shape: f32[3,3,128], index: 4, kind: output, shape index: {}]  }
   0x1 LB: > { %s419_s16 = sadd.s32 4294967295, %s462_s15   ;;  %p423_p0 = scmp.ge.s32.totalorder %s462_s15, 1  ;;  %s462_s15 = sphi %s489_s15, %s14_s15  }
   0x2   : > { %p169_p1 = scmp.lt.s32.totalorder %s462_s15, 4 }
   0x4   : > { %p170_p2 = pnand %p423_p0, %p169_p1 }
   0x5   : > { %v500_v0 = vld [vmem:[%s540_s3 + $0x8] sm:$0xff] (!%p170_p2)  ;;  %vm214_vm0 = vcmask (!%p170_p2), 1040384   ;;  %p196_p3 = scmp.lt.s32.totalorder (!%p170_p2), %s419_s16, 2  ;;  %v275_v1 = vlaneseq (!%p170_p2)  ;;  %v209_v5 = vld [vmem:[%s540_s3] sm:$0xff] (!%p170_p2)  ;;  %vm280_vm1 = vcmask (!%p170_p2), 1043456   ;;  %vm354_vm3 = vcmask (!%p170_p2), 1041408  }
   0x6   : > { %173 = sbr.rel (%p170_p2) target bundleno = 273 (0x111), region = 36  ;;  %v212_v2 = vrot.slane (!%p170_p2), %v500_v0, 4  ;;  %v271_v7 = vrot.slane (!%p170_p2), %v209_v5, 4  ;;  %v313_v21 = vrot.slane (!%p170_p2), %v500_v0, 3  ;;  %v208_v42 = vld [vmem:[%s538_s1] sm:$0x1] (!%p170_p2) }
   0x7   : > { %v276_v3 = vshrl.u32 (!%p170_p2), %v275_v1, 7  ;;  %v241_v50 = vsub.f32 (!%p170_p2), 1.0, %v208_v42  ;;  %v244_v51 = vmul.f32 (!%p170_p2), 0.5, %v208_v42  ;;  %v334_v55 = vrot.slane (!%p170_p2), %v500_v0, 2 }
   0x8   : > { %v215_v4 = vsel (!%p170_p2), %vm214_vm0, %v212_v2, 0.0 }
   0x9   : > { %216 = vadd.xlane.f32.xlu0 (!%p170_p2), %v215_v4  ;;  %v277_v6 = vsub.s32 (!%p170_p2), 4, %v276_v3  ;;  %v245_v62 = vsub.f32 (!%p170_p2), 0.75, %v244_v51 }
   0xb   : > { %v278_v15 = vrot.slane (!%p170_p2), %v500_v0, %v277_v6 }
   0xd   : > { %s543_s16 = smov (!%p196_p3, %s419_s16), 2 }
   0xe   : > { %s424_s19 = sshll.u32 %s543_s16, 2  ;;  %s198_s24 = scalar_lea.vmem %s537_s0, %s543_s16 }
   0xf   : > { %s202_s27 = scalar_lea.vmem %s539_s2, %s424_s19  ;;  %v207_v8 = vld [vmem:[%s198_s24] sm:$0x1]  ;;  %s206_s10 = scalar_lea.vmem %s541_s4, %s424_s19 }
  0x10   : > { %v268_v9 = vld [vmem:[%s202_s27] sm:$0xf]  ;;  %v229_v10 = vand.u32 2147483647, %v207_v8  ;;  %v246_v44 = vmax.f32 %v207_v8, 0.0  ;;  %v247_v45 = vmul.f32 %v208_v42, %v207_v8  ;;  %vm236_vm2 = vcmp.ge.f32.partialorder %v207_v8, 0.0 }
  0x11   : > { %v269_v11 = vmul.f32 %v268_v9, %v500_v0  ;;  %v295_v12 = vrot.slane %v268_v9, 6  ;;  %v302_v13 = vmin.f32 %v268_v9, %v209_v5  ;;  %v303_v14 = vmax.f32 %v268_v9, %v209_v5 }
  0x12   : > { %v230_v16 = vsub.f32 0.0, %v229_v10  ;;  %v248_v52 = vsub.f32 %v246_v44, %v247_v45 }
  0x13   : > { %v273_v17 = vsub.f32 %v269_v11, %v271_v7  ;;  %v305_v18 = vrot.slane %v303_v14, 6  ;;  %v319_v19 = vrot.slane %v302_v13, 6  ;;  %v297_v20 = vsub.f32 %v268_v9, %v295_v12 }
  0x14   : > { %v231_v22 = vmul.f32 1.442695, %v230_v16 }
  0x15   : > { %v274_v23 = vand.u32 2147483647, %v273_v17  ;;  %v321_v24 = vsub.f32 %v303_v14, %v319_v19  ;;  %v299_v25 = vrot.slane %v297_v20, 1  ;;  %v307_v26 = vsub.f32 %v302_v13, %v305_v18 }
  0x16   : > { %444 = vpow2.f32 %v231_v22 }
  0x17   : > { %v279_v27 = vmul.f32 %v278_v15, %v274_v23  ;;  %v301_v28 = vmul.f32 %v299_v25, %v297_v20  ;;  %v308_v29 = vmax.f32 %v307_v26, 0.0  ;;  %v323_v30 = vrot.slane %v321_v24, 1 }
  0x19   : > { %v281_v31 = vsel %vm280_vm1, %v279_v27, 0.0  ;;  %v310_v32 = vrot.slane %v308_v29, 1  ;;  %v315_v33 = vadd.f32 %v313_v21, %v301_v28  ;;  %v325_v34 = vmul.f32 %v323_v30, %v321_v24 }
  0x1a   : > { %282 = vadd.xlane.f32.xlu1 %v281_v31 }
  0x1b   : > { %v312_v35 = vmul.f32 %v310_v32, %v308_v29  ;;  %v326_v36 = vmax.f32 %v325_v34, 1e-06 }
  0x1d   : > { %v316_v37 = vsub.f32 %v315_v33, %v312_v35  ;;  %446 = vrcp.f32 %v326_v36 }
  0x1f   : > { %v317_v38 = vmax.f32 %v316_v37, 1e-06 }
  0x20   : > { %v445_v39 = vpop.eup %444 }
  0x21   : > { %448 = vrcp.f32 %v317_v38  ;;  %v233_v40 = vadd.f32 1.0, %v445_v39  ;;  %v329_v41 = vsub.f32 %v326_v36, %v317_v38 }
  0x23   : > { %450 = vrcp.f32 %v233_v40 }
  0x24   : > { %452 = vlog2.f32 %v233_v40 }
  0x27   : > { %v447_v43 = vpop.eup %446 }
  0x28   : > { %v331_v46 = vmul.f32 %v447_v43, %v329_v41 }
  0x2b   : > { %v449_v47 = vpop.eup %448 }
  0x2c   : > { %v328_v48 = vmul.f32 %v449_v47, %v312_v35 }
  0x2d   : > { %v451_v49 = vpop.eup %450 }
  0x2e   : > { %v453_v53 = vpop.eup %452  ;;  %v332_v54 = vsub.f32 %v328_v48, %v331_v46  ;;  %v237_v56 = vsub.f32 1.0, %v451_v49 }
  0x2f   : > { %v250_v57 = vmul.f32 0.6931472, %v453_v53 }
  0x30   : > { %v333_v58 = vsub.f32 1.0, %v332_v54  ;;  %v238_v59 = vsel %vm236_vm2, %v451_v49, %v237_v56 }
  0x31   : > { %v239_v60 = vsub.f32 1.0, %v238_v59  ;;  %v242_v61 = vmul.f32 %v241_v50, %v238_v59  ;;  %v251_v63 = vadd.f32 %v250_v57, %v248_v52 }
  0x32   : > { %v336_v1 = vmul.f32 %v334_v55, %v333_v58 }
  0x33   : > { %v240_v2 = vmul.f32 %v239_v60, %v208_v42  ;;  %v252_v5 = vmul.f32 %v251_v63, %v245_v62 }
  0x34   : > { %v338_v3 = vrot.slane %v336_v1, 2 }
  0x35   : > { %v243_v4 = vadd.f32 %v242_v61, %v240_v2 }
  0x36   : > { %v340_v6 = vsel %vm214_vm0, %v338_v3, 0.0 }
  0x37   : > { %341 = vadd.xlane.f32.xlu1 %v340_v6  ;;  %v253_v7 = vmul.f32 %v243_v4, %v243_v4 }
  0x39   : > { %v254_v8 = vmul.f32 %v253_v7, %v252_v5 }
  0x3b   : > { %v255_v0 = vsel %vm214_vm0, %v254_v8, 0.0 }
  0x3c   : > { %256 = vadd.xlane.f32.xlu0 %v255_v0 }
  0x96   : > { %v217_v9 = vpop.xlane.xlu0 %216 }
  0x97   : > { %v218_v10 = vrot.slane %v217_v9, 4 }
  0x99   : > { %v219_v11 = vadd.f32 %v218_v10, %v217_v9 }
  0x9b   : > { %v220_v12 = vrot.slane %v219_v11, 2 }
  0x9d   : > { %v221_v13 = vadd.f32 %v220_v12, %v219_v11 }
  0x9f   : > { %v222_v14 = vrot.slane %v221_v13, 1 }
  0xa1   : > { %v223_v15 = vadd.f32 %v222_v14, %v221_v13 }
  0xa3   : > { %428 = vpush %v223_v15 }
  0xa7   : > { %v283_v16 = vpop.xlane.xlu1 %282 }
  0xa8   : > { %v284_v17 = vrot.slane %v283_v16, 4 }
  0xaa   : > { %v285_v19 = vadd.f32 %v284_v17, %v283_v16 }
  0xac   : > { %v286_v22 = vrot.slane %v285_v19, 2 }
  0xae   : > { %v287_v27 = vadd.f32 %v286_v22, %v285_v19 }
  0xb0   : > { %v288_v31 = vrot.slane %v287_v27, 1 }
  0xb2   : > { %v289_v35 = vadd.f32 %v288_v31, %v287_v27 }
  0xc4   : > { %v342_v18 = vpop.xlane.xlu1 %341 }
  0xc5   : > { %v343_v20 = vrot.slane %v342_v18, 4 }
  0xc7   : > { %v344_v21 = vadd.f32 %v343_v20, %v342_v18 }
  0xc9   : > { %v257_v23 = vpop.xlane.xlu0 %256  ;;  %v345_v24 = vrot.slane %v344_v21, 2 }
  0xca   : > { %v258_v25 = vrot.slane %v257_v23, 4 }
  0xcb   : > { %v346_v28 = vadd.f32 %v345_v24, %v344_v21 }
  0xcc   : > { %v259_v26 = vadd.f32 %v258_v25, %v257_v23 }
  0xcd   : > { %v347_v33 = vrot.slane %v346_v28, 1 }
  0xce   : > { %v260_v29 = vrot.slane %v259_v26, 2 }
  0xcf   : > { %v348_v36 = vadd.f32 %v347_v33, %v346_v28 }
  0xd0   : > { %v261_v30 = vadd.f32 %v260_v29, %v259_v26 }
  0xd2   : > { %v262_v32 = vrot.slane %v261_v30, 1 }
  0xd4   : > { %v263_v34 = vadd.f32 %v262_v32, %v261_v30  ;;  %s429_s30 = spop %428 }
  0xd5   : > { %v225_v37 = vstv %s429_s30 }
  0xd6   : > { %430 = vpush %v263_v34  ;;  %v226_v38 = vmax.f32 %v225_v37, 1.0 }
  0xd7   : > { %432 = vpush %v289_v35 }
  0xd8   : > { %434 = vpush %v348_v36  ;;  %454 = vrcp.f32 %v226_v38 }
  0xe2   : > { %v455_v42 = vpop.eup %454 }
 0x107   : > { %s431_s5 = spop %430 }
 0x108   : > { %v265_v39 = vstv %s431_s5  ;;  %s433_s6 = spop %432 }
 0x109   : > { %v266_v40 = vmul.f32 2.0, %v265_v39  ;;  %v291_v41 = vstv %s433_s6  ;;  %s435_s7 = spop %434 }
 0x10a   : > { %v292_v43 = vmul.f32 5.0, %v291_v41  ;;  %v350_v44 = vstv %s435_s7 }
 0x10b   : > { %v267_v45 = vmul.f32 %v455_v42, %v266_v40  ;;  %v351_v46 = vmul.f32 2.0, %v350_v44 }
 0x10c   : > { %v293_v47 = vmul.f32 %v455_v42, %v292_v43 }
 0x10d   : > { %v352_v48 = vmul.f32 %v455_v42, %v351_v46 }
 0x10e   : > { %v353_v49 = vsel %vm214_vm0, %v267_v45, %v293_v47 }
 0x10f   : > { %v355_v50 = vsel %vm354_vm3, %v353_v49, %v352_v48 }
 0x110   : > { %356 = vst [vmem:[%s206_s10] sm:$0x7] %v355_v50 }
 0x111 PF: > { %s14_s15 = sadd.s32 1, %s462_s15  }
 0x112   : > { %p11_p4 = scmp.ge.s32.totalorder %s14_s15, 5  }
 0x114   :  { %13 = sbr.rel (!%p11_p4) target bundleno = 1 (0x1), region = 69 }

</bundles_post_ra>
